<compile_context>
chip_gen: v6e
topology: v6e:2x2x1
jax: 0.10.0
libtpu: 0.0.40
codegen_flags: <defaults>
</compile_context>

<pallas_src>
import functools

import jax
import jax.numpy as jnp
from jax.experimental import pallas as pl
from jax.experimental.pallas import tpu as pltpu


def _round_up(v: int, m: int) -> int:
    return ((v + m - 1) // m) * m


def _linear_kernel_out_acc(x_ref, w_ref, b_ref, o_ref, *, cast_bf16):
    """f32-output path: accumulate directly into the (k-resident) output block."""
    # x_ref: (tm, tk)   w_ref: (tk, tn)   b_ref: (1, tn)   o_ref: (tm, tn) f32
    k = pl.program_id(2)

    @pl.when(k == 0)
    def _():
        o_ref[...] = jnp.broadcast_to(b_ref[...].astype(o_ref.dtype), o_ref.shape)

    a = x_ref[...]
    b = w_ref[...]
    if cast_bf16:
        a = a.astype(jnp.bfloat16)
        b = b.astype(jnp.bfloat16)
    o_ref[...] += jnp.dot(a, b, preferred_element_type=jnp.float32)


def _linear_kernel_scratch(x_ref, w_ref, b_ref, o_ref, acc_ref, *, cast_bf16):
    """Generic path (low-precision outputs): f32 scratch accumulator + final cast."""
    k = pl.program_id(2)

    @pl.when(k == 0)
    def _():
        acc_ref[...] = jnp.broadcast_to(
            b_ref[...].astype(jnp.float32), acc_ref.shape
        )

    a = x_ref[...]
    b = w_ref[...]
    if cast_bf16:
        a = a.astype(jnp.bfloat16)
        b = b.astype(jnp.bfloat16)
    acc_ref[...] += jnp.dot(a, b, preferred_element_type=jnp.float32)

    @pl.when(k == pl.num_programs(2) - 1)
    def _():
        o_ref[...] = acc_ref[...].astype(o_ref.dtype)


@functools.partial(
    jax.jit,
    static_argnames=("tm_target", "tn_target", "tk_target", "use_bf16_mxu"),
)
def linear_forward(
    x,
    weight,
    bias,
    *,
    tm_target=512,
    tn_target=512,
    tk_target=1024,
    use_bf16_mxu=False,
):
    """y = x @ weight.T + bias  (PyTorch nn.Linear semantics).

    x:      (B, in_features)             float32
    weight: (out_features, in_features)  float32
    bias:   (out_features,)              float32
    returns (B, out_features)            same dtype as x
    """
    B, K = x.shape
    N, Kw = weight.shape
    assert K == Kw, "weight in_features mismatch"

    out_dtype = x.dtype

    # Tile sizes: cap targets by the (aligned) problem size, then pad the problem
    # up to a whole number of tiles. Lane dims (K, N) aligned to 128, M to 8.
    tm = min(tm_target, _round_up(B, 8))
    tn = min(tn_target, _round_up(N, 128))
    tk = min(tk_target, _round_up(K, 128))

    m_pad = _round_up(B, tm)
    n_pad = _round_up(N, tn)
    k_pad = _round_up(K, tk)

    # v7x has 2 TensorCores: make sure at least one "parallel" grid axis has >=2
    # blocks when the problem allows it (small-batch M => split along N instead).
    if m_pad // tm == 1 and n_pad // tn == 1 and n_pad >= 256:
        tn = max(128, _round_up(n_pad // 2, 128))
        n_pad = _round_up(N, tn)

    # Pre-transpose weight once to (K, N): the kernel then runs a plain NN
    # contraction on the MXU with no in-kernel transpose. Amortized for a reused
    # nn.Linear weight; negligible next to the matmul otherwise.
    w_t = weight.T  # (K, N)

    x_p = x
    if (m_pad, k_pad) != (B, K):
        x_p = jnp.pad(x, ((0, m_pad - B), (0, k_pad - K)))
    w_p = w_t
    if (k_pad, n_pad) != (K, N):
        w_p = jnp.pad(w_t, ((0, k_pad - K), (0, n_pad - N)))
    b_p = bias
    if n_pad != N:
        b_p = jnp.pad(bias, (0, n_pad - N))
    b_2d = b_p.reshape(1, n_pad)

    grid = (m_pad // tm, n_pad // tn, k_pad // tk)

    # f32 output: accumulate straight into the resident output block (no scratch).
    f32_out = jnp.dtype(out_dtype) == jnp.dtype(jnp.float32)
    if f32_out:
        kernel = functools.partial(_linear_kernel_out_acc, cast_bf16=use_bf16_mxu)
        scratch_shapes = []
    else:
        kernel = functools.partial(_linear_kernel_scratch, cast_bf16=use_bf16_mxu)
        scratch_shapes = [pltpu.VMEM((tm, tn), jnp.float32)]

    in_itemsize = jnp.dtype(x_p.dtype).itemsize
    out_itemsize = jnp.dtype(out_dtype).itemsize

    # Actual HBM traffic: x is re-read (n_pad//tn) times, W is re-read
    # (m_pad//tm) times; output written once; bias negligible but counted.
    cost = pl.CostEstimate(
        flops=2 * m_pad * n_pad * k_pad,
        transcendentals=0,
        bytes_accessed=(
            m_pad * k_pad * (n_pad // tn) * in_itemsize
            + k_pad * n_pad * (m_pad // tm) * in_itemsize
            + m_pad * n_pad * out_itemsize
            + n_pad * in_itemsize
        ),
    )

    # Double-buffered VMEM footprint (+ scratch + bias) with headroom.
    vmem_bytes = (
        2 * tm * tk * in_itemsize          # x tiles
        + 2 * tk * tn * in_itemsize        # w tiles
        + 2 * tm * tn * out_itemsize       # out tiles
        + (0 if f32_out else tm * tn * 4)  # acc scratch
        + 2 * tn * 4                       # bias tiles
    )
    vmem_limit = min(64 << 20, max(32 << 20, int(vmem_bytes * 1.25) + (2 << 20)))

    y_pad = pl.pallas_call(
        kernel,
        out_shape=jax.ShapeDtypeStruct((m_pad, n_pad), out_dtype),
        grid_spec=pltpu.PrefetchScalarGridSpec(
            num_scalar_prefetch=0,
            grid=grid,
            in_specs=[
                pl.BlockSpec((tm, tk), lambda i, j, k: (i, k)),  # x tile
                pl.BlockSpec((tk, tn), lambda i, j, k: (k, j)),  # W^T tile (K, N)
                pl.BlockSpec((1, tn), lambda i, j, k: (0, j)),   # bias tile
            ],
            out_specs=pl.BlockSpec((tm, tn), lambda i, j, k: (i, j)),
            scratch_shapes=scratch_shapes,
        ),
        compiler_params=pltpu.CompilerParams(
            dimension_semantics=("parallel", "parallel", "arbitrary"),
            vmem_limit_bytes=vmem_limit,
        ),
        cost_estimate=cost,
    )(x_p, w_p, b_2d)

    return y_pad[:B, :N]


if __name__ == "__main__":
    # Small shapes consistent with nn.Linear(in_features, out_features).
    batch = 8
    in_features = 32
    out_features = 16

    key = jax.random.PRNGKey(0)
    kx, kw, kb = jax.random.split(key, 3)

    # Deterministic init matching nn.Linear's default uniform(-1/sqrt(in), 1/sqrt(in)).
    bound = 1.0 / jnp.sqrt(jnp.float32(in_features))
    weight = jax.random.uniform(
        kw, (out_features, in_features), jnp.float32, -bound, bound
    )
    bias = jax.random.uniform(kb, (out_features,), jnp.float32, -bound, bound)
    x = jax.random.normal(kx, (batch, in_features), jnp.float32)

    y = linear_forward(x, weight, bias)
    jax.block_until_ready(y)

    # Reference check against plain JAX (same math as torch.nn.Linear).
    y_ref = x @ weight.T + bias
    assert y.shape == (batch, out_features)
    assert jnp.allclose(y, y_ref, atol=1e-5, rtol=1e-5)

    # TODO(synk): LinearNN.predict (pandas DataFrame I/O) is host-side glue, not a kernel.
    print("KERNEL_OK")
</pallas_src>

<mosaic_0001>
module attributes {stable_mosaic.version = 11 : i64} {
  func.func @_linear_kernel_out_acc(%arg0: i32, %arg1: i32, %arg2: i32, %arg3: memref<8x128xf32, #tpu.memory_space<vmem>>, %arg4: memref<128x128xf32, #tpu.memory_space<vmem>>, %arg5: memref<1x128xf32, #tpu.memory_space<vmem>>, %arg6: memref<8x128xf32, #tpu.memory_space<vmem>>) attributes {dimension_semantics = [#tpu.dimension_semantics<parallel>, #tpu.dimension_semantics<parallel>, #tpu.dimension_semantics<arbitrary>], iteration_bounds = array<i64: 1, 1, 1>, scalar_prefetch = 0 : i64, scratch_operands = 0 : i64, tpu.core_type = #tpu.core_type<tc>, window_params = [{transform_indices = @transform_0, window_bounds = array<i64: 8, 128>}, {transform_indices = @transform_1, window_bounds = array<i64: 128, 128>}, {transform_indices = @transform_2, window_bounds = array<i64: 1, 128>}, {transform_indices = @transform_3, window_bounds = array<i64: 8, 128>}]} {
    %c0_i32 = arith.constant 0 : i32
    %0 = arith.cmpi eq, %arg2, %c0_i32 : i32
    %1 = arith.extui %0 : i1 to i32
    %c0_i32_0 = arith.constant 0 : i32
    %2 = arith.cmpi ne, %1, %c0_i32_0 : i32
    scf.if %2 {
      %c0_8 = arith.constant 0 : index
      %c0_9 = arith.constant 0 : index
      %9 = vector.load %arg5[%c0_8, %c0_9] : memref<1x128xf32, #tpu.memory_space<vmem>>, vector<1x128xf32>
      %10 = vector.shape_cast %9 : vector<1x128xf32> to vector<1x128xf32>
      %11 = vector.broadcast %10 : vector<1x128xf32> to vector<8x128xf32>
      %c0_10 = arith.constant 0 : index
      %c0_11 = arith.constant 0 : index
      %12 = vector.load %arg6[%c0_10, %c0_11] : memref<8x128xf32, #tpu.memory_space<vmem>>, vector<8x128xf32>
      tpu.vector_store %arg6[%c0_10, %c0_11], %11 {strides = array<i32>} : memref<8x128xf32, #tpu.memory_space<vmem>>, vector<8x128xf32>,
    } else {
    }
    %c0 = arith.constant 0 : index
    %c0_1 = arith.constant 0 : index
    %3 = vector.load %arg3[%c0, %c0_1] : memref<8x128xf32, #tpu.memory_space<vmem>>, vector<8x128xf32>
    %c0_2 = arith.constant 0 : index
    %c0_3 = arith.constant 0 : index
    %4 = vector.load %arg4[%c0_2, %c0_3] : memref<128x128xf32, #tpu.memory_space<vmem>>, vector<128x128xf32>
    %c0_4 = arith.constant 0 : index
    %c0_5 = arith.constant 0 : index
    %5 = vector.load %arg6[%c0_4, %c0_5] : memref<8x128xf32, #tpu.memory_space<vmem>>, vector<8x128xf32>
    %cst = arith.constant dense<0.000000e+00> : vector<8x128xf32>
    %6 = tpu.matmul %3, %4, %cst {dimension_numbers = #tpu.dot_dimension_numbers<[1], [0], [0], [1], [0, 0, 1, 1], [], []>} : vector<8x128xf32>, vector<128x128xf32>, vector<8x128xf32> -> vector<8x128xf32>
    %7 = arith.addf %5, %6 : vector<8x128xf32>
    %c0_6 = arith.constant 0 : index
    %c0_7 = arith.constant 0 : index
    %8 = vector.load %arg6[%c0_6, %c0_7] : memref<8x128xf32, #tpu.memory_space<vmem>>, vector<8x128xf32>
    tpu.vector_store %arg6[%c0_6, %c0_7], %7 {strides = array<i32>} : memref<8x128xf32, #tpu.memory_space<vmem>>, vector<8x128xf32>,
    return
  }
  func.func @transform_0(%arg0: i32, %arg1: i32, %arg2: i32) -> (i32, i32) {
    %c0_i32 = arith.constant 0 : i32
    return %arg0, %arg2 : i32, i32
  }
  func.func @transform_1(%arg0: i32, %arg1: i32, %arg2: i32) -> (i32, i32) {
    %c0_i32 = arith.constant 0 : i32
    return %arg2, %arg1 : i32, i32
  }
  func.func @transform_2(%arg0: i32, %arg1: i32, %arg2: i32) -> (i32, i32) {
    %c0_i32 = arith.constant 0 : i32
    %c0_i32_0 = arith.constant 0 : i32
    return %c0_i32, %arg1 : i32, i32
  }
  func.func @transform_3(%arg0: i32, %arg1: i32, %arg2: i32) -> (i32, i32) {
    %c0_i32 = arith.constant 0 : i32
    return %arg0, %arg1 : i32, i32
  }
}

</mosaic_0001>

<bundles_post_ra>
// kernel: linear_forward.1
= control target key start
LH: loop header
LB: loop body
LE: loop exit
PB: predicated region body
PF: predicated region fallthrough
CT: control target
= control target key end

     0   :  { %v209_v1 = vmov 0.0   ;;  %vm210_vm0 = vmmov 0   ;;  %s289_s0 = inlined_call_operand.vmem [shape: f32[8,128], index: 0, kind: input, shape index: {}]   ;;  %s290_s1 = inlined_call_operand.vmem [shape: f32[128,128], index: 1, kind: input, shape index: {}]   ;;  %s291_s2 = inlined_call_operand.vmem [shape: f32[1,128], index: 2, kind: input, shape index: {}]   ;;  %s292_s3 = inlined_call_operand.hbm [shape: f32[8,128], index: 3, kind: output, shape index: {}]  }
   0x1   :  { %v43_v0 = vld [vmem:[%s290_s1 + $0x78] sm:$0xff]  ;;  %149 = vmatprep.subr.mxu0 %v209_v1  ;;  %v42_v2 = vld [vmem:[%s290_s1 + $0x70] sm:$0xff]  ;;  %181 = vmatprep.mubr.msk.f32.mxu0 %vm210_vm0, %v209_v1  ;;  %v41_v3 = vld [vmem:[%s290_s1 + $0x68] sm:$0xff] }
   0x2   :  { %150 = vmatpush3.msra.mxu0 %v43_v0  ;;  %v40_v4 = vld [vmem:[%s290_s1 + $0x60] sm:$0xff] }
   0x3   :  { %151 = vmatprep.subr.mxu0 %v209_v1 }
   0x4   :  { %152 = vmatpush3.msra.mxu0 %v42_v2 }
   0x5   :  { %153 = vmatprep.subr.mxu0 %v209_v1 }
   0x6   :  { %154 = vmatpush3.msra.mxu0 %v41_v3 }
   0x7   :  { %8 = vsyncpa [#allocation3], 0  ;;  %155 = vmatprep.subr.mxu0 %v209_v1  ;;  %v39_v5 = vld [vmem:[%s290_s1 + $0x58] sm:$0xff]  ;;  %v38_v6 = vld [vmem:[%s290_s1 + $0x50] sm:$0xff]  ;;  %s211_s21 = smov [#allocation2]  }
   0x8   :  { %156 = vmatpush3.msra.mxu0 %v40_v4  ;;  %v37_v7 = vld [vmem:[%s290_s1 + $0x48] sm:$0xff]  ;;  %v36_v8 = vld [vmem:[%s290_s1 + $0x40] sm:$0xff]  ;;  %v35_v9 = vld [vmem:[%s290_s1 + $0x38] sm:$0xff]  ;;  %s123_s22 = sshll.u32 %s211_s21, 4  ;;  %s124_s22 = int_to_ptr.vmem [resolvable:$true] %s123_s22 }
   0x9   :  { %157 = vmatprep.subr.mxu0 %v209_v1  ;;  %v34_v10 = vld [vmem:[%s290_s1 + $0x30] sm:$0xff]  ;;  %v33_v11 = vld [vmem:[%s290_s1 + $0x28] sm:$0xff]  ;;  %v32_v12 = vld [vmem:[%s290_s1 + $0x20] sm:$0xff]  ;;  %p192_p1 = scmp.lt.s32.totalorder %s124_s22, %s124_s22 }
   0xa   :  { %158 = vmatpush3.msra.mxu0 %v39_v5  ;;  %v31_v13 = vld [vmem:[%s290_s1 + $0x18] sm:$0xff]  ;;  %v30_v14 = vld [vmem:[%s290_s1 + $0x10] sm:$0xff]  ;;  %v29_v15 = vld [vmem:[%s290_s1 + $0x8] sm:$0xff] }
   0xb   :  { %159 = vmatprep.subr.mxu0 %v209_v1  ;;  %v28_v16 = vld [vmem:[%s290_s1] sm:$0xff]  ;;  %s187_s1 = scalar_lea.vmem %s124_s22, 128 }
   0xc   :  { %160 = vmatpush3.msra.mxu0 %v38_v6  ;;  %v27_v17 = vld [vmem:[%s289_s0] sm:$0xff]  ;;  %p188_p0 = scmp.ne.s32.totalorder %s124_s22, %s187_s1  ;;  %p193_p2 = scmp.lt.s32.totalorder %s187_s1, %s187_s1 }
   0xd   :  { %161 = vmatprep.subr.mxu0 %v209_v1  ;;  %v131_v18 = vld [vmem:[%s291_s2] ss:$0 sm:$0xff] }
   0xe   :  { %162 = vmatpush3.msra.mxu0 %v37_v7  ;;  %p194_p3 = por %p193_p2, %p192_p1 }
   0xf   :  { %163 = vmatprep.subr.mxu0 %v209_v1 }
  0x10   :  { %164 = vmatpush3.msra.mxu0 %v36_v8  ;;  %p195_p4 = pnand %p194_p3, %p188_p0 }
  0x11   :  { %165 = vmatprep.subr.mxu0 %v209_v1 }
  0x12   :  { %166 = vmatpush3.msra.mxu0 %v35_v9 }
  0x13   :  { %167 = vmatprep.subr.mxu0 %v209_v1 }
  0x14   :  { %168 = vmatpush3.msra.mxu0 %v34_v10 }
  0x15   :  { %169 = vmatprep.subr.mxu0 %v209_v1 }
  0x16   :  { %170 = vmatpush3.msra.mxu0 %v33_v11 }
  0x17   :  { %171 = vmatprep.subr.mxu0 %v209_v1 }
  0x18   :  { %172 = vmatpush3.msra.mxu0 %v32_v12 }
  0x19   :  { %173 = vmatprep.subr.mxu0 %v209_v1 }
  0x1a   :  { %174 = vmatpush3.msra.mxu0 %v31_v13 }
  0x1b   :  { %175 = vmatprep.subr.mxu0 %v209_v1 }
  0x1c   :  { %176 = vmatpush3.msra.mxu0 %v30_v14 }
  0x1d   :  { %177 = vmatprep.subr.mxu0 %v209_v1 }
  0x1e   :  { %178 = vmatpush3.msra.mxu0 %v29_v15 }
  0x1f   :  { %179 = vmatprep.subr.mxu0 %v209_v1 }
  0x20   :  { %180 = vmatpush3.msra.mxu0 %v28_v16 }
  0x21   :  { %182 = vmatmul.mubr.f32.vlgmr.msra.gmra.mxu0 %v27_v17 }
  0xe1   :  { %v111_v19 = vpop.f32.mrf.mxu0 }
  0xe2   :  { %v115_v20 = vadd.f32 %v131_v18, %v111_v19 }
  0xe3   :  { %v183_v21 = vpop.f32.mrf.mxu0 }
  0xe4   :  { %116 = vst [vmem:[#allocation2] sm:$0xff] %v115_v20 }
  0xe5   :  { %198 = shalt.err (!%p195_p4)
}
  0xe6   :  { %126 = dma.vmem_to_hbm [thread:$0]  %s124_s22, 128, %s292_s3, [#allocation3]  }
  0xe7   :  { %207 = dma.done.wait [#allocation3], 128  }
  0xe8   :  { %208 = vsyncadd [#allocation3], 4294967168 }
  0xe9   :  { %130 = vsyncpa [#allocation3], 1 }

</bundles_post_ra>
